<compile_context>
chip_gen: v7x
topology: tpu7x:2x2x1
jax: 0.10.0
libtpu: 0.0.40
codegen_flags: <defaults>
</compile_context>

<pallas_src>
import jax
import jax.numpy as jnp
from jax.experimental import pallas as pl
from jax.experimental.pallas import tpu as pltpu


def _round_up(n, m):
    return ((n + m - 1) // m) * m


def _mlp_kernel(xT_ref, w1T_ref, b1_ref, w2_ref, b2_ref, o_ref):
    # xT:  (8, TB)   -- batch on the lane axis
    # w1T: (16, 8)   -- fc1 weight, (out_features, in_features)
    # b1:  (16, 1)
    # w2:  (16, 1)   -- fc2 weight as a column
    # b2:  (1, 1)
    # o:   (1, TB)

    # fc1 on the MXU: (16, 8) @ (8, TB) -> (16, TB), f32 accumulation.
    h = jnp.dot(w1T_ref[...], xT_ref[...], preferred_element_type=jnp.float32)
    h = h + b1_ref[...]                      # lane-broadcast bias (16,1) -> (16,TB)
    h = jax.nn.sigmoid(h)                    # EUP transcendental
    # Dropout(0.5) -> identity (eval semantics).
    # fc2 as VPU multiply + 16-term sublane (XLU) reduce; avoids an N=1 MXU pass.
    out = jnp.sum(h * w2_ref[...], axis=0, keepdims=True) + b2_ref[...]  # (1, TB)
    o_ref[...] = out.astype(o_ref.dtype)


def salary_predictor_forward(x, w1, b1, w2, b2, *, block_b=4096):
    """x: (B, 8) f32; w1: (8, 16); b1: (1, 16) or (16,); w2: (16, 1); b2: (1, 1).

    Returns (B, 1) f32, matching Salary_Predictor.forward in eval mode.
    """
    B, in_f = x.shape
    hid = w1.shape[1]

    # Lane-dense layout: batch -> lane axis.
    xT = x.T                                  # (8, B)
    w1T = w1.T                                # (16, 8)
    b1c = jnp.reshape(b1, (-1, 1))            # (16, 1)
    w2c = jnp.reshape(w2, (-1, 1))            # (16, 1)
    b2c = jnp.reshape(b2, (1, 1))             # (1, 1)

    # Tile size: multiple of 128 lanes; shrink to the (padded) batch for small B.
    tb = min(block_b, _round_up(B, 128))
    Bp = _round_up(B, tb)
    if Bp != B:
        xT = jnp.pad(xT, ((0, 0), (0, Bp - B)))

    grid = (pl.cdiv(Bp, tb),)

    out_t = pl.pallas_call(
        _mlp_kernel,
        out_shape=jax.ShapeDtypeStruct((1, Bp), jnp.float32),
        grid=grid,
        in_specs=[
            pl.BlockSpec((in_f, tb), lambda i: (0, i)),   # x tile, streamed over B
            pl.BlockSpec((hid, in_f), lambda i: (0, 0)),  # w1T, VMEM-resident
            pl.BlockSpec((hid, 1), lambda i: (0, 0)),     # b1
            pl.BlockSpec((hid, 1), lambda i: (0, 0)),     # w2 column
            pl.BlockSpec((1, 1), lambda i: (0, 0)),       # b2
        ],
        out_specs=pl.BlockSpec((1, tb), lambda i: (0, i)),
        compiler_params=pltpu.CompilerParams(
            dimension_semantics=("parallel",),            # megacore / v7x 2-TC sharding
        ),
    )(xT, w1T, b1c, w2c, b2c)

    return out_t[:, :B].T                                  # back to (B, 1)


def _reference(x, w1, b1, w2, b2):
    h = jax.nn.sigmoid(x @ w1 + jnp.reshape(b1, (1, -1)))
    return h @ w2 + jnp.reshape(b2, (1, -1))


if __name__ == "__main__":
    key = jax.random.PRNGKey(0)
    kx, k1, kb1, k2, kb2 = jax.random.split(key, 5)

    B, IN, HID, OUT = 8, 8, 16, 1

    # Deterministic parameter init (uniform, like PyTorch's default Linear init scale)
    bound1 = 1.0 / (IN ** 0.5)
    bound2 = 1.0 / (HID ** 0.5)
    w1 = jax.random.uniform(k1, (IN, HID), jnp.float32, -bound1, bound1)
    b1 = jax.random.uniform(kb1, (1, HID), jnp.float32, -bound1, bound1)
    w2 = jax.random.uniform(k2, (HID, OUT), jnp.float32, -bound2, bound2)
    b2 = jax.random.uniform(kb2, (1, OUT), jnp.float32, -bound2, bound2)

    x = jax.random.normal(kx, (B, IN), jnp.float32)

    out = salary_predictor_forward(x, w1, b1, w2, b2)
    out = jax.block_until_ready(out)

    ref = _reference(x, w1, b1, w2, b2)
    assert out.shape == (B, OUT), out.shape
    assert jnp.allclose(out, ref, atol=1e-5, rtol=1e-5), (out, ref)

    # Also exercise the multi-tile / pipelined path with a larger batch.
    B2 = 9000  # non-multiple of the tile size -> exercises padding + slicing
    x2 = jax.random.normal(jax.random.PRNGKey(1), (B2, IN), jnp.float32)
    out2 = jax.block_until_ready(salary_predictor_forward(x2, w1, b1, w2, b2))
    ref2 = _reference(x2, w1, b1, w2, b2)
    assert out2.shape == (B2, OUT), out2.shape
    assert jnp.allclose(out2, ref2, atol=1e-5, rtol=1e-5)

    print("KERNEL_OK")
</pallas_src>

<mosaic_0001>
module attributes {stable_mosaic.version = 11 : i64} {
  func.func @_mlp_kernel(%arg0: i32, %arg1: memref<8x128xf32, #tpu.memory_space<vmem>>, %arg2: memref<16x8xf32, #tpu.memory_space<vmem>>, %arg3: memref<16x1xf32, #tpu.memory_space<vmem>>, %arg4: memref<16x1xf32, #tpu.memory_space<vmem>>, %arg5: memref<1x1xf32, #tpu.memory_space<vmem>>, %arg6: memref<1x128xf32, #tpu.memory_space<vmem>>) attributes {dimension_semantics = [#tpu.dimension_semantics<parallel>], iteration_bounds = array<i64: 1>, scalar_prefetch = 0 : i64, scratch_operands = 0 : i64, tpu.core_type = #tpu.core_type<tc>, window_params = [{transform_indices = @transform_0, window_bounds = array<i64: 8, 128>}, {pipeline_mode = #tpu.pipeline_mode<synchronous>, transform_indices = @transform_1, window_bounds = array<i64: 16, 8>}, {pipeline_mode = #tpu.pipeline_mode<synchronous>, transform_indices = @transform_2, window_bounds = array<i64: 16, 1>}, {pipeline_mode = #tpu.pipeline_mode<synchronous>, transform_indices = @transform_3, window_bounds = array<i64: 16, 1>}, {pipeline_mode = #tpu.pipeline_mode<synchronous>, transform_indices = @transform_4, window_bounds = array<i64: 1, 1>}, {transform_indices = @transform_5, window_bounds = array<i64: 1, 128>}]} {
    %c0 = arith.constant 0 : index
    %c0_0 = arith.constant 0 : index
    %0 = vector.load %arg2[%c0, %c0_0] : memref<16x8xf32, #tpu.memory_space<vmem>>, vector<16x8xf32>
    %c0_1 = arith.constant 0 : index
    %c0_2 = arith.constant 0 : index
    %1 = vector.load %arg1[%c0_1, %c0_2] : memref<8x128xf32, #tpu.memory_space<vmem>>, vector<8x128xf32>
    %cst = arith.constant dense<0.000000e+00> : vector<16x128xf32>
    %2 = tpu.matmul %0, %1, %cst {dimension_numbers = #tpu.dot_dimension_numbers<[1], [0], [0], [1], [0, 0, 1, 1], [], []>} : vector<16x8xf32>, vector<8x128xf32>, vector<16x128xf32> -> vector<16x128xf32>
    %c0_3 = arith.constant 0 : index
    %c0_4 = arith.constant 0 : index
    %3 = vector.load %arg3[%c0_3, %c0_4] : memref<16x1xf32, #tpu.memory_space<vmem>>, vector<16x1xf32>
    %4 = vector.broadcast %3 : vector<16x1xf32> to vector<16x128xf32>
    %5 = arith.addf %2, %4 : vector<16x128xf32>
    %6 = arith.negf %5 : vector<16x128xf32>
    %7 = math.exp %6 : vector<16x128xf32>
    %cst_5 = arith.constant 1.000000e+00 : f32
    %8 = vector.broadcast %cst_5 : f32 to vector<16x128xf32>
    %9 = arith.addf %8, %7 : vector<16x128xf32>
    %10 = arith.divf %8, %9 : vector<16x128xf32>
    %c0_6 = arith.constant 0 : index
    %c0_7 = arith.constant 0 : index
    %11 = vector.load %arg4[%c0_6, %c0_7] : memref<16x1xf32, #tpu.memory_space<vmem>>, vector<16x1xf32>
    %12 = vector.broadcast %11 : vector<16x1xf32> to vector<16x128xf32>
    %13 = arith.mulf %10, %12 : vector<16x128xf32>
    %cst_8 = arith.constant dense<0.000000e+00> : vector<128xf32>
    %14 = vector.multi_reduction <add>, %13, %cst_8 [0] : vector<16x128xf32> to vector<128xf32>
    %15 = vector.shape_cast %14 : vector<128xf32> to vector<1x128xf32>
    %c0_9 = arith.constant 0 : index
    %c0_10 = arith.constant 0 : index
    %16 = vector.load %arg5[%c0_9, %c0_10] : memref<1x1xf32, #tpu.memory_space<vmem>>, vector<1x1xf32>
    %17 = vector.broadcast %16 : vector<1x1xf32> to vector<1x128xf32>
    %18 = arith.addf %15, %17 : vector<1x128xf32>
    %c0_11 = arith.constant 0 : index
    %c0_12 = arith.constant 0 : index
    %19 = vector.load %arg6[%c0_11, %c0_12] : memref<1x128xf32, #tpu.memory_space<vmem>>, vector<1x128xf32>
    tpu.vector_store %arg6[%c0_11, %c0_12], %18 {strides = array<i32>} : memref<1x128xf32, #tpu.memory_space<vmem>>, vector<1x128xf32>,
    return
  }
  func.func @transform_0(%arg0: i32) -> (i32, i32) {
    %c0_i32 = arith.constant 0 : i32
    %c0_i32_0 = arith.constant 0 : i32
    return %c0_i32, %arg0 : i32, i32
  }
  func.func @transform_1(%arg0: i32) -> (i32, i32) {
    %c0_i32 = arith.constant 0 : i32
    %c0_i32_0 = arith.constant 0 : i32
    %c0_i32_1 = arith.constant 0 : i32
    return %c0_i32, %c0_i32_0 : i32, i32
  }
  func.func @transform_2(%arg0: i32) -> (i32, i32) {
    %c0_i32 = arith.constant 0 : i32
    %c0_i32_0 = arith.constant 0 : i32
    %c0_i32_1 = arith.constant 0 : i32
    return %c0_i32, %c0_i32_0 : i32, i32
  }
  func.func @transform_3(%arg0: i32) -> (i32, i32) {
    %c0_i32 = arith.constant 0 : i32
    %c0_i32_0 = arith.constant 0 : i32
    %c0_i32_1 = arith.constant 0 : i32
    return %c0_i32, %c0_i32_0 : i32, i32
  }
  func.func @transform_4(%arg0: i32) -> (i32, i32) {
    %c0_i32 = arith.constant 0 : i32
    %c0_i32_0 = arith.constant 0 : i32
    %c0_i32_1 = arith.constant 0 : i32
    return %c0_i32, %c0_i32_0 : i32, i32
  }
  func.func @transform_5(%arg0: i32) -> (i32, i32) {
    %c0_i32 = arith.constant 0 : i32
    %c0_i32_0 = arith.constant 0 : i32
    return %c0_i32, %arg0 : i32, i32
  }
}

</mosaic_0001>

<bundles_post_ra>
// kernel: tpu_custom_call.1
= control target key start
LH: loop header
LB: loop body
LE: loop exit
PB: predicated region body
PF: predicated region fallthrough
CT: control target
= control target key end

     0   :  { %s295_s0 = inlined_call_operand.vmem [shape: f32[8,128], index: 0, kind: input, shape index: {}]   ;;  %s296_s1 = inlined_call_operand.vmem [shape: f32[16,8], index: 1, kind: input, shape index: {}]   ;;  %s297_s2 = inlined_call_operand.vmem [shape: f32[16,1], index: 2, kind: input, shape index: {}]   ;;  %s298_s3 = inlined_call_operand.vmem [shape: f32[16,1], index: 3, kind: input, shape index: {}]   ;;  %s299_s4 = inlined_call_operand.<no memory space> [shape: f32[1,1], index: 4, kind: input, shape index: {}]   ;;  %s300_s5 = inlined_call_operand.hbm [shape: f32[1,128], index: 5, kind: output, shape index: {}]  }
   0x1   :  { %v10_v0 = vstv %s299_s4 }
   0x2   :  { %11 = vst [vmem:[#allocation2] sm:$0x1] %v10_v0 }
   0x3   :  { %v25_v1 = vld [vmem:[%s295_s0] sm:$0xff]  ;;  %vm38_vm0 = vcmask 64512   ;;  %v24_v3 = vld [vmem:[%s296_s1 + $0x8] sm:$0xff]  ;;  %v227_v5 = vmov 0  }
   0x4   :  { %v23_v2 = vld [vmem:[%s296_s1] sm:$0xff]  ;;  %186 = vmatprep.subr.mxu0 %v25_v1  ;;  %193 = vset.pattern.permute.xlu0 %v227_v5 }
   0x5   :  { %188 = vmatprep.mubr.msk.f32.mxu0 %vm38_vm0, %v23_v2  ;;  %v26_v4 = vld [vmem:[%s297_s2] sm:$0xff]  ;;  %187 = vmatpush3.msra.mxu0 %v25_v1 }
   0x6   :  { %v132_v6 = vld [vmem:[%s298_s3] sm:$0xff] }
   0x7   :  { %12 = vsyncpa [#allocation4], 0  ;;  %189 = vmatmul.mubr.msk.f32.vlgmr.msra.gmra.mrb[0].mxu0 %vm38_vm0, %v24_v3  ;;  %30 = vperm.xlu0 %193, %v26_v4   ;;  %v27_v7 = vld [vmem:[%s297_s2 + $0x8] sm:$0xff]  ;;  %v159_v28 = vlaneseq  ;;  %s228_s2 = smov [#allocation3]  }
   0x8   :  { %194 = vset.pattern.permute.xlu1 %v227_v5  ;;  %v133_v8 = vld [vmem:[%s298_s3 + $0x8] sm:$0xff]  ;;  %s171_s3 = sshll.u32 %s228_s2, 4  ;;  %s172_s3 = int_to_ptr.vmem [resolvable:$true] %s171_s3 }
   0x9   :  { %136 = vperm.xlu1 %194, %v132_v6   ;;  %v153_v9 = vld [vmem:[#allocation2] sm:$0x1]  ;;  %v160_v31 = vshrl.u32 %v159_v28, 7  ;;  %s203_s6 = scalar_lea.vmem %s172_s3, 16  ;;  %s207_s7 = scalar_lea.vmem %s172_s3, 32 }
   0xa   :  { %p204_p0 = scmp.ne.s32.totalorder %s172_s3, %s203_s6  ;;  %p208_p1 = scmp.lt.s32.totalorder %s172_s3, %s172_s3 }
   0xb   :  { %35 = vperm.xlu0 %193, %v27_v7   ;;  %v161_v34 = vsub.s32 0, %v160_v31  ;;  %p209_p2 = scmp.lt.s32.totalorder %s207_s7, %s203_s6 }
   0xd   :  { %141 = vperm.xlu1 %194, %v133_v8   ;;  %p210_p3 = por %p209_p2, %p208_p1 }
   0xf   :  { %156 = vperm.xlu0 %193, %v153_v9   ;;  %p211_p4 = pnand %p210_p3, %p204_p0 }
  0x86   :  { %v31_v10 = vpop.permute.xlu0 %30 }
  0x88   :  { %v137_v22 = vpop.permute.xlu1 %136 }
  0x8a   :  { %v36_v11 = vpop.permute.xlu0 %35 }
  0x8c   :  { %v142_v24 = vpop.permute.xlu1 %141 }
  0x8e   :  { %v157_v36 = vpop.permute.xlu0 %156 }
  0x8f   :  { %v162_v38 = vrot.slane %v157_v36, %v161_v34 }
  0xda   :  { %v190_v12 = vpop.f32.mrb[0].mxu0 }
  0xdb   :  { %v117_v13 = vadd.f32 %v190_v12, %v36_v11  ;;  %v111_v14 = vpop.f32.mrb[1].mxu0 }
  0xdc   :  { %v112_v15 = vadd.f32 %v111_v14, %v31_v10 }
  0xdd   :  { %v182_v16 = vmul.f32 -1.442695, %v117_v13 }
  0xde   :  { %v181_v17 = vmul.f32 -1.442695, %v112_v15 }
  0xdf   :  { %195 = vpow2.f32 %v182_v16 }
  0xe0   :  { %197 = vpow2.f32 %v181_v17 }
  0xe9   :  { %v196_v18 = vpop.eup %195 }
  0xea   :  { %v198_v19 = vpop.eup %197  ;;  %v127_v20 = vadd.f32 1.0, %v196_v18 }
  0xeb   :  { %v126_v21 = vadd.f32 1.0, %v198_v19 }
  0xec   :  { %199 = vrcp.f32 %v127_v20 }
  0xed   :  { %201 = vrcp.f32 %v126_v21 }
  0xf6   :  { %v200_v23 = vpop.eup %199 }
  0xf7   :  { %v202_v25 = vpop.eup %201  ;;  %v145_v26 = vmul.f32 %v200_v23, %v142_v24 }
  0xf8   :  { %v144_v27 = vmul.f32 %v202_v25, %v137_v22 }
  0xfa   :  { %v146_v29 = vadd.f32 %v145_v26, %v144_v27 }
  0xfc   :  { %v147_v30 = vrot.slane %v146_v29, 4 }
  0xfe   :  { %v148_v32 = vadd.f32 %v147_v30, %v146_v29 }
 0x100   :  { %v149_v33 = vrot.slane %v148_v32, 2 }
 0x102   :  { %v150_v35 = vadd.f32 %v149_v33, %v148_v32 }
 0x104   :  { %v151_v37 = vrot.slane %v150_v35, 1 }
 0x106   :  { %v152_v39 = vadd.f32 %v151_v37, %v150_v35 }
 0x108   :  { %v163_v40 = vadd.f32 %v162_v38, %v152_v39 }
 0x10a   :  { %164 = vst [vmem:[#allocation3] sm:$0x1] %v163_v40 }
 0x10b   :  { %214 = shalt.err (!%p211_p4)
}
 0x10c   :  { %s215_s10 = scalar_lea.hbm %s300_s5, 16 }
 0x10d   :  { %p216_p5 = scmp.ne.s32.totalorder %s300_s5, %s215_s10  ;;  %p219_p6 = scmp.lt.u32.totalorder %s215_s10, %s300_s5 }
 0x10f   :  { %p221_p7 = pnand %p219_p6, %p216_p5 }
 0x111   :  { %224 = shalt.err (!%p221_p7)
}
 0x112   :  { %174 = dma.vmem_to_hbm [thread:$0]  %s172_s3, 16, %s300_s5, [#allocation4]  }
 0x113   :  { %225 = dma.done.wait [#allocation4], 16  }
 0x114   :  { %226 = vsyncadd [#allocation4], 4294967280 }
 0x115   :  { %178 = vsyncpa [#allocation4], 1 }

</bundles_post_ra>
